<compile_context>
chip_gen: v5e
topology: v5e:2x2
jax: 0.10.0
libtpu: 0.0.40
codegen_flags: <defaults>
</compile_context>

<pallas_src>
import functools

import jax
import jax.numpy as jnp
from jax.experimental import pallas as pl
from jax.experimental.pallas import tpu as pltpu

HIDDEN1 = 256
HIDDEN2 = 128


def _round_up(n, m):
    return ((n + m - 1) // m) * m


def actor_mlp_kernel(x_ref, w1_ref, b1_ref, w2_ref, b2_ref, w3_ref, b3_ref, mu_ref):
    """mu = tanh(tanh(x@W1+b1)@W2+b2)@W3 + b3; f32 accumulation/bias/tanh."""
    x = x_ref[...]  # already in the compute dtype (f32 or bf16), no per-step cast
    h1 = jnp.tanh(
        jnp.dot(x, w1_ref[...], preferred_element_type=jnp.float32) + b1_ref[...]
    )
    h2 = jnp.tanh(
        jnp.dot(h1.astype(w2_ref.dtype), w2_ref[...],
                preferred_element_type=jnp.float32) + b2_ref[...]
    )
    mu = (
        jnp.dot(h2.astype(w3_ref.dtype), w3_ref[...],
                preferred_element_type=jnp.float32) + b3_ref[...]
    )
    # TODO(synk): forward() returns raw mu; if the policy head always applies
    # tanh(mu) * max_action, fuse it here (data already in vregs, EUP has slack).
    mu_ref[...] = mu.astype(mu_ref.dtype)


def prepare_params(params, compute_dtype=jnp.bfloat16):
    """One-time prep (call outside the per-step path): cast the MXU-fed weights
    to the compute dtype; biases stay f32 (bias add / tanh / acc are f32)."""
    w1, b1, w2, b2, w3, b3 = params
    return (
        w1.astype(compute_dtype), b1.astype(jnp.float32),
        w2.astype(compute_dtype), b2.astype(jnp.float32),
        w3.astype(compute_dtype), b3.astype(jnp.float32),
    )


def _pick_batch_tile(batch, block_b):
    """Balanced batch tiles: <= block_b rows per step, minimal row padding, and
    >= 2 steps once the batch is large enough so v7x's 2 TCs both get work."""
    steps = max(1, -(-batch // block_b))
    if batch >= 512:
        steps = max(steps, 2)
    rows = -(-batch // steps)
    return _round_up(rows, 8)


@functools.partial(jax.jit, static_argnames=("block_b",))
def continuous_actor_forward(x, prepared_params, *, block_b=2048):
    """Pallas forward of Continous_ActorModel. Returns mu of shape [B, action_dim]."""
    w1, b1, w2, b2, w3, b3 = prepared_params
    B, state_dim = x.shape
    action_dim = w3.shape[1]
    compute_dtype = w1.dtype

    tb = _pick_batch_tile(B, block_b)
    b_pad = _round_up(B, tb)

    xc = x.astype(compute_dtype)          # 2 B/elem DMA when bf16 feeds are used
    if b_pad != B:
        xc = jnp.pad(xc, ((0, b_pad - B), (0, 0)))

    resident = lambda i: (0, 0)           # weights/biases stay in VMEM every step

    out = pl.pallas_call(
        actor_mlp_kernel,
        out_shape=jax.ShapeDtypeStruct((b_pad, action_dim), jnp.float32),
        grid=(b_pad // tb,),
        in_specs=[
            pl.BlockSpec((tb, state_dim), lambda i: (i, 0)),   # x tile (pipelined)
            pl.BlockSpec((state_dim, HIDDEN1), resident),      # W1
            pl.BlockSpec((1, HIDDEN1), resident),              # b1
            pl.BlockSpec((HIDDEN1, HIDDEN2), resident),        # W2
            pl.BlockSpec((1, HIDDEN2), resident),              # b2
            pl.BlockSpec((HIDDEN2, action_dim), resident),     # W3 (unpadded)
            pl.BlockSpec((1, action_dim), resident),           # b3 (unpadded)
        ],
        out_specs=pl.BlockSpec((tb, action_dim), lambda i: (i, 0)),  # narrow store
        compiler_params=pltpu.CompilerParams(
            dimension_semantics=("parallel",),                 # v7x: 2 TCs split batch
        ),
    )(xc, w1, b1, w2, b2, w3, b3)

    if b_pad != B:
        out = out[:B]
    return out


def init_params(key, state_dim, action_dim):
    """Init matching the module: xavier_normal_ weights, PyTorch-default uniform
    biases. Weights stored as [in, out] (pre-transposed for the kernel)."""

    def xavier_normal(k, fan_in, fan_out):
        std = jnp.sqrt(2.0 / (fan_in + fan_out))
        return std * jax.random.normal(k, (fan_in, fan_out), dtype=jnp.float32)

    def bias_uniform(k, fan_in, fan_out):
        bound = 1.0 / jnp.sqrt(jnp.float32(fan_in))
        return jax.random.uniform(
            k, (1, fan_out), minval=-bound, maxval=bound, dtype=jnp.float32
        )

    ks = jax.random.split(key, 6)
    w1 = xavier_normal(ks[0], state_dim, HIDDEN1)
    b1 = bias_uniform(ks[1], state_dim, HIDDEN1)
    w2 = xavier_normal(ks[2], HIDDEN1, HIDDEN2)
    b2 = bias_uniform(ks[3], HIDDEN1, HIDDEN2)
    w3 = xavier_normal(ks[4], HIDDEN2, action_dim)
    b3 = bias_uniform(ks[5], HIDDEN2, action_dim)
    return (w1, b1, w2, b2, w3, b3)


if __name__ == "__main__":
    key = jax.random.PRNGKey(0)
    state_dim = 32
    action_dim = 8
    max_action = 1.0  # accepted by the module but unused in forward()

    k_params, k_x1, k_x2 = jax.random.split(key, 3)
    params = init_params(k_params, state_dim, action_dim)
    w1, b1, w2, b2, w3, b3 = params

    def reference(xx):
        h1 = jnp.tanh(xx @ w1 + b1)
        h2 = jnp.tanh(h1 @ w2 + b2)
        return h2 @ w3 + b3

    # 1) small batch, f32 MXU feeds: exact-semantics check, tight tolerance.
    x_small = jax.random.normal(k_x1, (8, state_dim), dtype=jnp.float32)
    p_f32 = prepare_params(params, compute_dtype=jnp.float32)
    mu = jax.block_until_ready(continuous_actor_forward(x_small, p_f32))
    assert mu.shape == (8, action_dim)
    assert jnp.allclose(mu, reference(x_small), atol=1e-5, rtol=1e-5)

    # 2) default bf16 MXU feeds + ragged batch (exercises row padding, output
    #    slice, and the 2-step "parallel" grid); looser tolerance for bf16 feeds.
    x_big = jax.random.normal(k_x2, (600, state_dim), dtype=jnp.float32)
    p_bf16 = prepare_params(params)  # bfloat16 by default
    mu_bf16 = jax.block_until_ready(continuous_actor_forward(x_big, p_bf16))
    assert mu_bf16.shape == (600, action_dim)
    assert jnp.allclose(mu_bf16, reference(x_big), atol=5e-2, rtol=5e-2)

    print("KERNEL_OK")
</pallas_src>

<mosaic_0001>
module attributes {stable_mosaic.version = 11 : i64} {
  func.func @actor_mlp_kernel(%arg0: i32, %arg1: memref<8x32xf32, #tpu.memory_space<vmem>>, %arg2: memref<32x256xf32, #tpu.memory_space<vmem>>, %arg3: memref<1x256xf32, #tpu.memory_space<vmem>>, %arg4: memref<256x128xf32, #tpu.memory_space<vmem>>, %arg5: memref<1x128xf32, #tpu.memory_space<vmem>>, %arg6: memref<128x8xf32, #tpu.memory_space<vmem>>, %arg7: memref<1x8xf32, #tpu.memory_space<vmem>>, %arg8: memref<8x8xf32, #tpu.memory_space<vmem>>) attributes {dimension_semantics = [#tpu.dimension_semantics<parallel>], iteration_bounds = array<i64: 1>, scalar_prefetch = 0 : i64, scratch_operands = 0 : i64, tpu.core_type = #tpu.core_type<tc>, window_params = [{transform_indices = @transform_0, window_bounds = array<i64: 8, 32>}, {pipeline_mode = #tpu.pipeline_mode<synchronous>, transform_indices = @transform_1, window_bounds = array<i64: 32, 256>}, {pipeline_mode = #tpu.pipeline_mode<synchronous>, transform_indices = @transform_2, window_bounds = array<i64: 1, 256>}, {pipeline_mode = #tpu.pipeline_mode<synchronous>, transform_indices = @transform_3, window_bounds = array<i64: 256, 128>}, {pipeline_mode = #tpu.pipeline_mode<synchronous>, transform_indices = @transform_4, window_bounds = array<i64: 1, 128>}, {pipeline_mode = #tpu.pipeline_mode<synchronous>, transform_indices = @transform_5, window_bounds = array<i64: 128, 8>}, {pipeline_mode = #tpu.pipeline_mode<synchronous>, transform_indices = @transform_6, window_bounds = array<i64: 1, 8>}, {transform_indices = @transform_7, window_bounds = array<i64: 8, 8>}]} {
    %c0 = arith.constant 0 : index
    %c0_0 = arith.constant 0 : index
    %0 = vector.load %arg1[%c0, %c0_0] : memref<8x32xf32, #tpu.memory_space<vmem>>, vector<8x32xf32>
    %c0_1 = arith.constant 0 : index
    %c0_2 = arith.constant 0 : index
    %1 = vector.load %arg2[%c0_1, %c0_2] : memref<32x256xf32, #tpu.memory_space<vmem>>, vector<32x256xf32>
    %cst = arith.constant dense<0.000000e+00> : vector<8x256xf32>
    %2 = tpu.matmul %0, %1, %cst {dimension_numbers = #tpu.dot_dimension_numbers<[1], [0], [0], [1], [0, 0, 1, 1], [], []>} : vector<8x32xf32>, vector<32x256xf32>, vector<8x256xf32> -> vector<8x256xf32>
    %c0_3 = arith.constant 0 : index
    %c0_4 = arith.constant 0 : index
    %3 = vector.load %arg3[%c0_3, %c0_4] : memref<1x256xf32, #tpu.memory_space<vmem>>, vector<1x256xf32>
    %4 = vector.broadcast %3 : vector<1x256xf32> to vector<8x256xf32>
    %5 = arith.addf %2, %4 : vector<8x256xf32>
    %6 = math.tanh %5 : vector<8x256xf32>
    %c0_5 = arith.constant 0 : index
    %c0_6 = arith.constant 0 : index
    %7 = vector.load %arg4[%c0_5, %c0_6] : memref<256x128xf32, #tpu.memory_space<vmem>>, vector<256x128xf32>
    %cst_7 = arith.constant dense<0.000000e+00> : vector<8x128xf32>
    %8 = tpu.matmul %6, %7, %cst_7 {dimension_numbers = #tpu.dot_dimension_numbers<[1], [0], [0], [1], [0, 0, 1, 1], [], []>} : vector<8x256xf32>, vector<256x128xf32>, vector<8x128xf32> -> vector<8x128xf32>
    %c0_8 = arith.constant 0 : index
    %c0_9 = arith.constant 0 : index
    %9 = vector.load %arg5[%c0_8, %c0_9] : memref<1x128xf32, #tpu.memory_space<vmem>>, vector<1x128xf32>
    %10 = vector.broadcast %9 : vector<1x128xf32> to vector<8x128xf32>
    %11 = arith.addf %8, %10 : vector<8x128xf32>
    %12 = math.tanh %11 : vector<8x128xf32>
    %c0_10 = arith.constant 0 : index
    %c0_11 = arith.constant 0 : index
    %13 = vector.load %arg6[%c0_10, %c0_11] : memref<128x8xf32, #tpu.memory_space<vmem>>, vector<128x8xf32>
    %cst_12 = arith.constant dense<0.000000e+00> : vector<8x8xf32>
    %14 = tpu.matmul %12, %13, %cst_12 {dimension_numbers = #tpu.dot_dimension_numbers<[1], [0], [0], [1], [0, 0, 1, 1], [], []>} : vector<8x128xf32>, vector<128x8xf32>, vector<8x8xf32> -> vector<8x8xf32>
    %c0_13 = arith.constant 0 : index
    %c0_14 = arith.constant 0 : index
    %15 = vector.load %arg7[%c0_13, %c0_14] : memref<1x8xf32, #tpu.memory_space<vmem>>, vector<1x8xf32>
    %16 = vector.broadcast %15 : vector<1x8xf32> to vector<8x8xf32>
    %17 = arith.addf %14, %16 : vector<8x8xf32>
    %c0_15 = arith.constant 0 : index
    %c0_16 = arith.constant 0 : index
    %18 = vector.load %arg8[%c0_15, %c0_16] : memref<8x8xf32, #tpu.memory_space<vmem>>, vector<8x8xf32>
    tpu.vector_store %arg8[%c0_15, %c0_16], %17 {strides = array<i32>} : memref<8x8xf32, #tpu.memory_space<vmem>>, vector<8x8xf32>,
    return
  }
  func.func @transform_0(%arg0: i32) -> (i32, i32) {
    %c0_i32 = arith.constant 0 : i32
    %c0_i32_0 = arith.constant 0 : i32
    return %arg0, %c0_i32 : i32, i32
  }
  func.func @transform_1(%arg0: i32) -> (i32, i32) {
    %c0_i32 = arith.constant 0 : i32
    %c0_i32_0 = arith.constant 0 : i32
    %c0_i32_1 = arith.constant 0 : i32
    return %c0_i32, %c0_i32_0 : i32, i32
  }
  func.func @transform_2(%arg0: i32) -> (i32, i32) {
    %c0_i32 = arith.constant 0 : i32
    %c0_i32_0 = arith.constant 0 : i32
    %c0_i32_1 = arith.constant 0 : i32
    return %c0_i32, %c0_i32_0 : i32, i32
  }
  func.func @transform_3(%arg0: i32) -> (i32, i32) {
    %c0_i32 = arith.constant 0 : i32
    %c0_i32_0 = arith.constant 0 : i32
    %c0_i32_1 = arith.constant 0 : i32
    return %c0_i32, %c0_i32_0 : i32, i32
  }
  func.func @transform_4(%arg0: i32) -> (i32, i32) {
    %c0_i32 = arith.constant 0 : i32
    %c0_i32_0 = arith.constant 0 : i32
    %c0_i32_1 = arith.constant 0 : i32
    return %c0_i32, %c0_i32_0 : i32, i32
  }
  func.func @transform_5(%arg0: i32) -> (i32, i32) {
    %c0_i32 = arith.constant 0 : i32
    %c0_i32_0 = arith.constant 0 : i32
    %c0_i32_1 = arith.constant 0 : i32
    return %c0_i32, %c0_i32_0 : i32, i32
  }
  func.func @transform_6(%arg0: i32) -> (i32, i32) {
    %c0_i32 = arith.constant 0 : i32
    %c0_i32_0 = arith.constant 0 : i32
    %c0_i32_1 = arith.constant 0 : i32
    return %c0_i32, %c0_i32_0 : i32, i32
  }
  func.func @transform_7(%arg0: i32) -> (i32, i32) {
    %c0_i32 = arith.constant 0 : i32
    %c0_i32_0 = arith.constant 0 : i32
    return %arg0, %c0_i32 : i32, i32
  }
}

</mosaic_0001>

<bundles_post_ra>
// kernel: continuous_actor_forward.1
= control target key start
LH: loop header
LB: loop body
LE: loop exit
PB: predicated region body
PF: predicated region fallthrough
CT: control target
= control target key end

     0   :  { %12 = vsyncpa [#allocation3], 0  ;;  %s442_s0 = inlined_call_operand.vmem [shape: f32[8,32], index: 0, kind: input, shape index: {}]   ;;  %s443_s1 = inlined_call_operand.vmem [shape: f32[32,256], index: 1, kind: input, shape index: {}]   ;;  %s444_s2 = inlined_call_operand.vmem [shape: f32[1,256], index: 2, kind: input, shape index: {}]   ;;  %s445_s3 = inlined_call_operand.hbm [shape: f32[256,128], index: 3, kind: input, shape index: {}]   ;;  %s446_s4 = inlined_call_operand.vmem [shape: f32[1,128], index: 4, kind: input, shape index: {}]   ;;  %s447_s5 = inlined_call_operand.vmem [shape: f32[128,8], index: 5, kind: input, shape index: {}]   ;;  %s448_s6 = inlined_call_operand.vmem [shape: f32[1,8], index: 6, kind: input, shape index: {}]   ;;  %s449_s7 = inlined_call_operand.hbm [shape: f32[8,8], index: 7, kind: output, shape index: {}]  }
   0x1   :  { %13 = vsyncpa [#allocation4], 0  ;;  %s24_s26 = sshll.u32 %s445_s3, 4  ;;  %s306_s27 = smov [#allocation2]   ;;  %s25_s26 = int_to_ptr.hbm [resolvable:$true] %s24_s26 }
   0x2   :  { %s26_s28 = sshll.u32 %s306_s27, 4  ;;  %s307_s29 = smov 128   ;;  %s27_s28 = int_to_ptr.vmem [resolvable:$true] %s26_s28 }
   0x3   :  { %s308_s30 = smov 8  }
   0x4   :  { %32 = dma.hbm_to_vmem [thread:$0]  %s25_s26, 4096, %s27_s28, [#allocation3], %s307_s29, %s307_s29, %s308_s30  }
   0x5   :  { %302 = dma.done.wait [#allocation3], 4096  }
   0x6   :  { %303 = vsyncadd [#allocation3], 4294963200  ;;  %v50_v0 = vld [vmem:[%s443_s1 + $0x30] sm:$0xff]  ;;  %v48_v1 = vld [vmem:[%s443_s1 + $0x20] sm:$0xff]  ;;  %vm58_vm0 = vcmask 261120   ;;  %s309_s11 = smov [#allocation5]  }
   0x7   :  { %74 = vmatpush.msra.mxu1 %v50_v0  ;;  %v46_v2 = vld [vmem:[%s443_s1 + $0x10] sm:$0xff]  ;;  %v119_v3 = vld [vmem:[#allocation2 + $0x78] sm:$0xff]  ;;  %v44_v5 = vld [vmem:[%s443_s1] sm:$0xff]  ;;  %s228_s12 = sshll.u32 %s309_s11, 4  ;;  %s230_s13 = sshll.u32 %s449_s7, 4  ;;  %vm221_vm1 = vcmask 64512   ;;  %s229_s12 = int_to_ptr.vmem [resolvable:$true] %s228_s12  ;;  %s231_s13 = int_to_ptr.hbm [resolvable:$true] %s230_s13 }
   0x8   :  { %v118_v4 = vld [vmem:[#allocation2 + $0x70] sm:$0xff]  ;;  %140 = vmatpush.msra.mxu2 %v119_v3  ;;  %v135_v6 = vld [vmem:[#allocation2 + $0xf8] sm:$0xff]  ;;  %v43_v7 = vld [vmem:[%s442_s0] sm:$0xff] }
   0x9   :  { %75 = vmatpush.msra.mxu1 %v48_v1  ;;  %v117_v8 = vld [vmem:[#allocation2 + $0x68] sm:$0xff]  ;;  %160 = vmatpush.msra.mxu3 %v135_v6  ;;  %v134_v9 = vld [vmem:[#allocation2 + $0xf0] sm:$0xff]  ;;  %v51_v10 = vld [vmem:[%s443_s1 + $0x38] sm:$0xff] }
   0xa   :  { %141 = vmatpush.msra.mxu2 %v118_v4  ;;  %v133_v11 = vld [vmem:[#allocation2 + $0xe8] sm:$0xff]  ;;  %v116_v12 = vld [vmem:[#allocation2 + $0x60] sm:$0xff]  ;;  %v115_v15 = vld [vmem:[#allocation2 + $0x58] sm:$0xff] }
   0xb   :  { %76 = vmatpush.msra.mxu1 %v46_v2  ;;  %161 = vmatpush.msra.mxu3 %v134_v9  ;;  %v49_v13 = vld [vmem:[%s443_s1 + $0x28] sm:$0xff]  ;;  %v132_v14 = vld [vmem:[#allocation2 + $0xe0] sm:$0xff]  ;;  %v47_v16 = vld [vmem:[%s443_s1 + $0x18] sm:$0xff] }
   0xc   :  { %142 = vmatpush.msra.mxu2 %v117_v8  ;;  %v131_v17 = vld [vmem:[#allocation2 + $0xd8] sm:$0xff]  ;;  %v114_v18 = vld [vmem:[#allocation2 + $0x50] sm:$0xff]  ;;  %v45_v19 = vld [vmem:[%s443_s1 + $0x8] sm:$0xff] }
   0xd   :  { %77 = vmatpush.msra.mxu1 %v44_v5  ;;  %162 = vmatpush.msra.mxu3 %v133_v11  ;;  %v130_v20 = vld [vmem:[#allocation2 + $0xd0] sm:$0xff]  ;;  %v113_v21 = vld [vmem:[#allocation2 + $0x48] sm:$0xff]  ;;  %v112_v23 = vld [vmem:[#allocation2 + $0x40] sm:$0xff] }
   0xe   :  { %240 = vmatmul.msk.f32.vlgmr.msra.gmra.mxu1 %vm58_vm0, %v43_v7  ;;  %143 = vmatpush.msra.mxu2 %v116_v12  ;;  %v129_v22 = vld [vmem:[#allocation2 + $0xc8] sm:$0xff]  ;;  %v111_v24 = vld [vmem:[#allocation2 + $0x38] sm:$0xff]  ;;  %v110_v25 = vld [vmem:[#allocation2 + $0x30] sm:$0xff] }
   0xf   :  { %94 = vmatpush.msrb.mxu1 %v51_v10  ;;  %163 = vmatpush.msra.mxu3 %v132_v14  ;;  %v109_v26 = vld [vmem:[#allocation2 + $0x28] sm:$0xff]  ;;  %v108_v27 = vld [vmem:[#allocation2 + $0x20] sm:$0xff]  ;;  %v107_v29 = vld [vmem:[#allocation2 + $0x18] sm:$0xff] }
  0x10   :  { %144 = vmatpush.msra.mxu2 %v115_v15  ;;  %v128_v28 = vld [vmem:[#allocation2 + $0xc0] sm:$0xff]  ;;  %v127_v30 = vld [vmem:[#allocation2 + $0xb8] sm:$0xff]  ;;  %v106_v31 = vld [vmem:[#allocation2 + $0x10] sm:$0xff] }
  0x11   :  { %95 = vmatpush.msrb.mxu1 %v49_v13  ;;  %164 = vmatpush.msra.mxu3 %v131_v17  ;;  %v126_v32 = vld [vmem:[#allocation2 + $0xb0] sm:$0xff]  ;;  %v105_v33 = vld [vmem:[#allocation2 + $0x8] sm:$0xff]  ;;  %v104_v35 = vld [vmem:[#allocation2] sm:$0xff] }
  0x12   :  { %145 = vmatpush.msra.mxu2 %v114_v18  ;;  %v125_v34 = vld [vmem:[#allocation2 + $0xa8] sm:$0xff]  ;;  %v124_v36 = vld [vmem:[#allocation2 + $0xa0] sm:$0xff]  ;;  %v123_v37 = vld [vmem:[#allocation2 + $0x98] sm:$0xff] }
  0x13   :  { %96 = vmatpush.msrb.mxu1 %v47_v16  ;;  %165 = vmatpush.msra.mxu3 %v130_v20  ;;  %v122_v38 = vld [vmem:[#allocation2 + $0x90] sm:$0xff]  ;;  %v121_v39 = vld [vmem:[#allocation2 + $0x88] sm:$0xff]  ;;  %v120_v40 = vld [vmem:[#allocation2 + $0x80] sm:$0xff] }
  0x14   :  { %146 = vmatpush.msra.mxu2 %v113_v21  ;;  %v196_v41 = vld [vmem:[%s447_s5 + $0x78] sm:$0xff]  ;;  %v195_v42 = vld [vmem:[%s447_s5 + $0x70] sm:$0xff]  ;;  %v194_v43 = vld [vmem:[%s447_s5 + $0x68] sm:$0xff] }
  0x15   :  { %97 = vmatpush.msrb.mxu1 %v45_v19  ;;  %166 = vmatpush.msra.mxu3 %v129_v22  ;;  %v193_v44 = vld [vmem:[%s447_s5 + $0x60] sm:$0xff]  ;;  %v192_v45 = vld [vmem:[%s447_s5 + $0x58] sm:$0xff]  ;;  %v191_v47 = vld [vmem:[%s447_s5 + $0x50] sm:$0xff] }
  0x16   :  { %241 = vmatmul.msk.f32.vlgmr.msrb.gmra.mxu1 %vm58_vm0, %v43_v7  ;;  %147 = vmatpush.msra.mxu2 %v112_v23  ;;  %v52_v46 = vld [vmem:[%s444_s2] sm:$0x3]  ;;  %v190_v48 = vld [vmem:[%s447_s5 + $0x48] sm:$0xff]  ;;  %v188_v58 = vld [vmem:[%s447_s5 + $0x38] sm:$0xff] }
  0x17   :  { %167 = vmatpush.msra.mxu3 %v128_v28  ;;  %201 = vmatpush.msra.mxu0 %v196_v41  ;;  %v54_v49 = vperm.slane %v52_v46, 0  ;;  %v55_v52 = vperm.slane %v52_v46, 1  ;;  %v189_v57 = vld [vmem:[%s447_s5 + $0x40] sm:$0xff]  ;;  %v187_v59 = vld [vmem:[%s447_s5 + $0x30] sm:$0xff]  ;;  %v186_v60 = vld [vmem:[%s447_s5 + $0x28] sm:$0xff] }
  0x18   :  { %148 = vmatpush.msra.mxu2 %v111_v24  ;;  %v185_v61 = vld [vmem:[%s447_s5 + $0x20] sm:$0xff]  ;;  %v184_v62 = vld [vmem:[%s447_s5 + $0x18] sm:$0xff]  ;;  %v183_v63 = vld [vmem:[%s447_s5 + $0x10] sm:$0xff] }
  0x19   :  { %168 = vmatpush.msra.mxu3 %v127_v30  ;;  %202 = vmatpush.msra.mxu0 %v195_v42  ;;  %v182_v0 = vld [vmem:[%s447_s5 + $0x8] sm:$0xff]  ;;  %v181_v1 = vld [vmem:[%s447_s5] sm:$0xff] }
  0x1a   :  { %149 = vmatpush.msra.mxu2 %v110_v25  ;;  %v246_v2 = vld [vmem:[%s446_s4] ss:$0 sm:$0xff] }
  0x1b   :  { %169 = vmatpush.msra.mxu3 %v126_v32  ;;  %203 = vmatpush.msra.mxu0 %v194_v43  ;;  %v247_v8 = vld [vmem:[%s448_s6] ss:$0 sm:$0xff] }
  0x1c   :  { %150 = vmatpush.msra.mxu2 %v109_v26 }
  0x1d   :  { %170 = vmatpush.msra.mxu3 %v125_v34  ;;  %204 = vmatpush.msra.mxu0 %v193_v44 }
  0x1e   :  { %151 = vmatpush.msra.mxu2 %v108_v27 }
  0x1f   :  { %171 = vmatpush.msra.mxu3 %v124_v36  ;;  %205 = vmatpush.msra.mxu0 %v192_v45 }
  0x20   :  { %152 = vmatpush.msra.mxu2 %v107_v29 }
  0x21   :  { %172 = vmatpush.msra.mxu3 %v123_v37  ;;  %206 = vmatpush.msra.mxu0 %v191_v47 }
  0x22   :  { %153 = vmatpush.msra.mxu2 %v106_v31 }
  0x23   :  { %173 = vmatpush.msra.mxu3 %v122_v38  ;;  %207 = vmatpush.msra.mxu0 %v190_v48 }
  0x24   :  { %154 = vmatpush.msra.mxu2 %v105_v33 }
  0x25   :  { %174 = vmatpush.msra.mxu3 %v121_v39  ;;  %208 = vmatpush.msra.mxu0 %v189_v57 }
  0x26   :  { %155 = vmatpush.msra.mxu2 %v104_v35 }
  0x27   :  { %175 = vmatpush.msra.mxu3 %v120_v40  ;;  %209 = vmatpush.msra.mxu0 %v188_v58 }
  0x29   :  { %210 = vmatpush.msra.mxu0 %v187_v59 }
  0x2b   :  { %211 = vmatpush.msra.mxu0 %v186_v60 }
  0x2d   :  { %212 = vmatpush.msra.mxu0 %v185_v61 }
  0x2f   :  { %213 = vmatpush.msra.mxu0 %v184_v62 }
  0x31   :  { %214 = vmatpush.msra.mxu0 %v183_v63 }
  0x33   :  { %215 = vmatpush.msra.mxu0 %v182_v0 }
  0x35   :  { %216 = vmatpush.msra.mxu0 %v181_v1 }
  0x8b   :  { %v79_v50 = vpop.f32.mrf.mxu1 }
  0x8c   :  { %v80_v51 = vadd.f32 %v79_v50, %v54_v49 }
  0x8e   :  { %248 = vtanh.f32 %v80_v51 }
  0x93   :  { %v99_v53 = vpop.f32.mrf.mxu1 }
  0x94   :  { %v249_v54 = vpop.eup %248  ;;  %v100_v55 = vadd.f32 %v99_v53, %v55_v52 }
  0x95   :  { %156 = vmatmul.f32.vlgmr.msra.gmra.mxu2 %v249_v54 }
  0x96   :  { %250 = vtanh.f32 %v100_v55 }
  0x9c   :  { %v251_v56 = vpop.eup %250 }
  0x9d   :  { %176 = vmatmul.f32.vlgmr.msra.gmra.mxu3 %v251_v56 }
 0x118   :  { %v157_v3 = vpop.f32.mrf.mxu2 }
 0x119   :  { %v158_v4 = vadd.f32 %v246_v2, %v157_v3 }
 0x120   :  { %v177_v5 = vpop.f32.mrf.mxu3 }
 0x121   :  { %v178_v6 = vadd.f32 %v177_v5, %v158_v4 }
 0x123   :  { %252 = vtanh.f32 %v178_v6 }
 0x129   :  { %v253_v7 = vpop.eup %252 }
 0x12a   :  { %217 = vmatmul.f32.vlgmr.msra.gmra.mxu0 %v253_v7 }
 0x1a7   :  { %v218_v9 = vpop.f32.mrf.mxu0 }
 0x1a8   :  { %v219_v10 = vadd.f32 %v247_v8, %v218_v9 }
 0x1aa   :  { %222 = vst.msk [vmem:[#allocation5] sm:$0xff] %vm221_vm1, %v219_v10 }
 0x1ab   :  { %233 = dma.vmem_to_hbm [thread:$0]  %s229_s12, 128, %s231_s13, [#allocation4]  }
 0x1ac   :  { %304 = dma.done.wait [#allocation4], 128  }
 0x1ad   :  { %305 = vsyncadd [#allocation4], 4294967168 }
 0x1ae   :  { %238 = vsyncpa [#allocation3], 1 }
 0x1af   :  { %239 = vsyncpa [#allocation4], 1 }

</bundles_post_ra>
